<compile_context>
chip_gen: v6e
topology: v6e:2x2x1
jax: 0.10.0
libtpu: 0.0.40
codegen_flags: <defaults>
</compile_context>

<pallas_src>
import functools

import jax
import jax.numpy as jnp
from jax.experimental import pallas as pl
from jax.experimental.pallas import tpu as pltpu

ALPHA = 0.25
GAMMA = 2

_LANES = 128
# 2048 x 128 x 4 B = 1 MiB per f32 buffer; 2 inputs + 1 output, double-buffered
# ~= 6 MiB VMEM -> comfortably inside the default scoped VMEM on v5e/v6e/v7x.
_MAX_TILE_ROWS = 2048


def _pow_one_minus_p(one_minus_p, gamma):
    """(1 - p) ** gamma. Static multiply chain for small non-negative int gamma."""
    if isinstance(gamma, int) and 0 <= gamma <= 8:
        if gamma == 0:
            return jnp.ones_like(one_minus_p)
        acc = one_minus_p
        for _ in range(gamma - 1):
            acc = acc * one_minus_p
        return acc
    return jnp.power(one_minus_p, jnp.float32(gamma))


def _focal_loss_kernel(pred_ref, target_ref, out_ref, *, alpha, gamma):
    pred = pred_ref[...].astype(jnp.float32)
    tgt = target_ref[...].astype(jnp.float32)

    is_pos = tgt > 0.5  # target == 1

    probs = jnp.where(is_pos, pred, 1.0 - pred)
    probs = jnp.clip(probs, 0.0001, 1.0)
    log_p = jnp.log(probs)

    alpha_t = jnp.where(is_pos, jnp.float32(alpha), jnp.float32(1.0 - alpha))
    focal = _pow_one_minus_p(1.0 - probs, gamma)

    out_ref[...] = (-alpha_t * focal * log_p).astype(out_ref.dtype)


def focal_loss(pred, target, *, alpha=ALPHA, gamma=GAMMA):
    """Pallas TPU focal loss. Returns (N, 1) per-element loss like the PyTorch module."""
    out_dtype = pred.dtype
    pred_flat = pred.reshape(-1)          # keep native dtype (bf16/f32/...)
    target_flat = target.reshape(-1)      # keep native dtype (int8/f32/...)
    if target_flat.dtype == jnp.bool_:
        target_flat = target_flat.astype(jnp.int8)

    n = pred_flat.shape[0]

    # Only pad up to a lane multiple (128) so the lane-dense 2-D reshape is legal;
    # the row (sublane) dimension is left ragged and the tail block is masked by
    # Pallas.  For N % 128 == 0 there is no pad (and no extra HBM copy) at all.
    n_pad = pl.cdiv(n, _LANES) * _LANES
    if n_pad != n:
        pred_flat = jnp.pad(pred_flat, (0, n_pad - n))
        target_flat = jnp.pad(target_flat, (0, n_pad - n))

    rows = n_pad // _LANES
    pred2d = pred_flat.reshape(rows, _LANES)
    target2d = target_flat.reshape(rows, _LANES)

    # Large tile for HBM-bound elementwise work; full-extent block if the array
    # is small (full extent is always a legal block shape).
    tile_rows = _MAX_TILE_ROWS if rows >= _MAX_TILE_ROWS else rows
    grid = (pl.cdiv(rows, tile_rows),)

    kernel = functools.partial(_focal_loss_kernel, alpha=float(alpha), gamma=gamma)

    out2d = pl.pallas_call(
        kernel,
        out_shape=jax.ShapeDtypeStruct((rows, _LANES), out_dtype),
        grid_spec=pltpu.PrefetchScalarGridSpec(
            num_scalar_prefetch=0,
            grid=grid,
            in_specs=[
                pl.BlockSpec((tile_rows, _LANES), lambda i: (i, 0)),
                pl.BlockSpec((tile_rows, _LANES), lambda i: (i, 0)),
            ],
            out_specs=pl.BlockSpec((tile_rows, _LANES), lambda i: (i, 0)),
        ),
        compiler_params=pltpu.CompilerParams(
            dimension_semantics=("parallel",),
        ),
    )(pred2d, target2d)

    return out2d.reshape(-1)[:n].reshape(-1, 1)


def focal_loss_ref(pred, target, *, alpha=ALPHA, gamma=GAMMA):
    """Pure-JAX reference mirroring the PyTorch forward."""
    p = pred.reshape(-1).astype(jnp.float32)
    t = target.reshape(-1).astype(jnp.float32)
    probs = jnp.where(t > 0.5, p, 1.0 - p)
    probs = jnp.clip(probs, 0.0001, 1.0)
    log_p = jnp.log(probs)
    alpha_t = jnp.where(t > 0.5, alpha, 1.0 - alpha)
    loss = -alpha_t * (1.0 - probs) ** gamma * log_p
    return loss.reshape(-1, 1)


if __name__ == "__main__":
    key = jax.random.PRNGKey(0)
    k_pred, k_tgt = jax.random.split(key)

    # Small shapes: predictions are probabilities in (0, 1), targets are 0/1 labels.
    shape = (2, 4, 16, 16)  # N = 2048
    pred = jax.nn.sigmoid(jax.random.normal(k_pred, shape, dtype=jnp.float32))
    target = (jax.random.uniform(k_tgt, shape) > 0.5).astype(jnp.float32)

    out = focal_loss(pred, target)
    out = jax.block_until_ready(out)

    ref = focal_loss_ref(pred, target)
    assert out.shape == (pred.size, 1), out.shape
    assert jnp.allclose(out, ref, rtol=1e-5, atol=1e-6), "mismatch vs reference"

    print("KERNEL_OK")
</pallas_src>

<mosaic_0001>
module attributes {stable_mosaic.version = 11 : i64} {
  func.func @_focal_loss_kernel(%arg0: i32, %arg1: memref<16x128xf32, #tpu.memory_space<vmem>>, %arg2: memref<16x128xf32, #tpu.memory_space<vmem>>, %arg3: memref<16x128xf32, #tpu.memory_space<vmem>>) attributes {dimension_semantics = [#tpu.dimension_semantics<parallel>], iteration_bounds = array<i64: 1>, scalar_prefetch = 0 : i64, scratch_operands = 0 : i64, tpu.core_type = #tpu.core_type<tc>, window_params = [{transform_indices = @transform_0, window_bounds = array<i64: 16, 128>}, {transform_indices = @transform_1, window_bounds = array<i64: 16, 128>}, {transform_indices = @transform_2, window_bounds = array<i64: 16, 128>}]} {
    %c0 = arith.constant 0 : index
    %c0_0 = arith.constant 0 : index
    %0 = vector.load %arg1[%c0, %c0_0] : memref<16x128xf32, #tpu.memory_space<vmem>>, vector<16x128xf32>
    %c0_1 = arith.constant 0 : index
    %c0_2 = arith.constant 0 : index
    %1 = vector.load %arg2[%c0_1, %c0_2] : memref<16x128xf32, #tpu.memory_space<vmem>>, vector<16x128xf32>
    %cst = arith.constant 5.000000e-01 : f32
    %2 = vector.broadcast %cst : f32 to vector<16x128xf32>
    %3 = arith.cmpf ogt, %1, %2 : vector<16x128xf32>
    %cst_3 = arith.constant 1.000000e+00 : f32
    %4 = vector.broadcast %cst_3 : f32 to vector<16x128xf32>
    %5 = arith.subf %4, %0 : vector<16x128xf32>
    %6 = arith.select %3, %0, %5 : vector<16x128xi1>, vector<16x128xf32>
    %cst_4 = arith.constant 9.99999974E-5 : f32
    %cst_5 = arith.constant 1.000000e+00 : f32
    %7 = vector.broadcast %cst_4 : f32 to vector<16x128xf32>
    %8 = arith.maximumf %7, %6 : vector<16x128xf32>
    %9 = vector.broadcast %cst_5 : f32 to vector<16x128xf32>
    %10 = arith.minimumf %9, %8 : vector<16x128xf32>
    %11 = math.log %10 : vector<16x128xf32>
    %cst_6 = arith.constant 2.500000e-01 : f32
    %cst_7 = arith.constant 7.500000e-01 : f32
    %12 = vector.broadcast %cst_6 : f32 to vector<16x128xf32>
    %13 = vector.broadcast %cst_7 : f32 to vector<16x128xf32>
    %14 = arith.select %3, %12, %13 : vector<16x128xi1>, vector<16x128xf32>
    %cst_8 = arith.constant 1.000000e+00 : f32
    %15 = vector.broadcast %cst_8 : f32 to vector<16x128xf32>
    %16 = arith.subf %15, %10 : vector<16x128xf32>
    %17 = arith.mulf %16, %16 : vector<16x128xf32>
    %cst_9 = arith.constant 0.000000e+00 : f32
    %18 = vector.broadcast %cst_9 : f32 to vector<16x128xf32>
    %19 = arith.subf %18, %14 : vector<16x128xf32>
    %20 = arith.mulf %19, %17 : vector<16x128xf32>
    %21 = arith.mulf %20, %11 : vector<16x128xf32>
    %c0_10 = arith.constant 0 : index
    %c0_11 = arith.constant 0 : index
    %22 = vector.load %arg3[%c0_10, %c0_11] : memref<16x128xf32, #tpu.memory_space<vmem>>, vector<16x128xf32>
    tpu.vector_store %arg3[%c0_10, %c0_11], %21 {strides = array<i32>} : memref<16x128xf32, #tpu.memory_space<vmem>>, vector<16x128xf32>,
    return
  }
  func.func @transform_0(%arg0: i32) -> (i32, i32) {
    %c0_i32 = arith.constant 0 : i32
    %c0_i32_0 = arith.constant 0 : i32
    return %arg0, %c0_i32 : i32, i32
  }
  func.func @transform_1(%arg0: i32) -> (i32, i32) {
    %c0_i32 = arith.constant 0 : i32
    %c0_i32_0 = arith.constant 0 : i32
    return %arg0, %c0_i32 : i32, i32
  }
  func.func @transform_2(%arg0: i32) -> (i32, i32) {
    %c0_i32 = arith.constant 0 : i32
    %c0_i32_0 = arith.constant 0 : i32
    return %arg0, %c0_i32 : i32, i32
  }
}

</mosaic_0001>

<bundles_post_ra>
// kernel: tpu_custom_call.1
= control target key start
LH: loop header
LB: loop body
LE: loop exit
PB: predicated region body
PF: predicated region fallthrough
CT: control target
= control target key end

     0   :  { %7 = vsyncpa [#allocation3], 0  ;;  %s205_s0 = inlined_call_operand.hbm [shape: f32[16,128], index: 0, kind: input, shape index: {}]   ;;  %s206_s1 = inlined_call_operand.hbm [shape: f32[16,128], index: 1, kind: input, shape index: {}]   ;;  %s207_s2 = inlined_call_operand.hbm [shape: f32[16,128], index: 2, kind: output, shape index: {}]  }
   0x1   :  { %8 = vsyncpa [#allocation6], 0 }
   0x2   :  { %9 = vsyncpa [#allocation4], 0  ;;  %s166_s9 = smov [#allocation2]  }
   0x3   :  { %s15_s10 = sshll.u32 %s166_s9, 4  ;;  %s16_s10 = int_to_ptr.vmem [resolvable:$true] %s15_s10 }
   0x4   :  { %s108_s11 = scalar_lea.vmem %s16_s10, 256  ;;  %p113_p1 = scmp.lt.s32.totalorder %s16_s10, %s16_s10 }
   0x5   :  { %p109_p0 = scmp.ne.s32.totalorder %s16_s10, %s108_s11  ;;  %p114_p2 = scmp.lt.s32.totalorder %s108_s11, %s108_s11 }
   0x7   :  { %p115_p3 = por %p114_p2, %p113_p1 }
   0x9   :  { %p116_p4 = pnand %p115_p3, %p109_p0 }
   0xb   :  { %119 = shalt.err (!%p116_p4)
}
   0xc   :  { %s167_s12 = smov 128   ;;  %s168_s13 = smov 8  }
   0xd   :  { %21 = dma.hbm_to_vmem [thread:$0]  %s205_s0, 256, %s16_s10, [#allocation3], %s167_s12, %s167_s12, %s168_s13  }
   0xe   :  { %s169_s16 = smov [#allocation5]  }
   0xf   :  { %s27_s17 = sshll.u32 %s169_s16, 4  ;;  %s28_s17 = int_to_ptr.vmem [resolvable:$true] %s27_s17 }
  0x10   :  { %s128_s18 = scalar_lea.vmem %s28_s17, 256  ;;  %p133_p6 = scmp.lt.s32.totalorder %s28_s17, %s28_s17 }
  0x11   :  { %p129_p5 = scmp.ne.s32.totalorder %s28_s17, %s128_s18  ;;  %p134_p7 = scmp.lt.s32.totalorder %s128_s18, %s128_s18 }
  0x13   :  { %p135_p8 = por %p134_p7, %p133_p6 }
  0x15   :  { %p136_p9 = pnand %p135_p8, %p129_p5 }
  0x17   :  { %139 = shalt.err (!%p136_p9)
}
  0x18   :  { %33 = dma.hbm_to_vmem [thread:$0]  %s206_s1, 256, %s28_s17, [#allocation6], %s167_s12, %s167_s12, %s168_s13  }
  0x19   :  { %160 = dma.done.wait [#allocation3], 256  }
  0x1a   :  { %161 = vsyncadd [#allocation3], 4294967040 }
  0x1b   :  { %162 = dma.done.wait [#allocation6], 256  }
  0x1c   :  { %163 = vsyncadd [#allocation6], 4294967040  ;;  %v40_v0 = vld [vmem:[#allocation2] sm:$0xff]  ;;  %v42_v1 = vld [vmem:[#allocation5] sm:$0xff]  ;;  %v170_v13 = vmov 0.75   ;;  %s171_s0 = smov [#allocation7]  }
  0x1d   :  { %v41_v2 = vld [vmem:[#allocation2 + $0x8] sm:$0xff]  ;;  %vm44_vm0 = vcmp.gt.f32.partialorder %v42_v1, 0.5  ;;  %v46_v3 = vsub.f32 1.0, %v40_v0  ;;  %v43_v4 = vld [vmem:[#allocation5 + $0x8] sm:$0xff]  ;;  %s77_s1 = sshll.u32 %s171_s0, 4  ;;  %s78_s1 = int_to_ptr.vmem [resolvable:$true] %s77_s1 }
  0x1e   :  { %v47_v5 = vsub.f32 1.0, %v41_v2  ;;  %vm45_vm1 = vcmp.gt.f32.partialorder %v43_v4, 0.5  ;;  %v58_v14 = vsel %vm44_vm0, 0.25, %v170_v13  ;;  %s140_s21 = scalar_lea.vmem %s78_s1, 256  ;;  %p145_p11 = scmp.lt.s32.totalorder %s78_s1, %s78_s1 }
  0x1f   :  { %v48_v6 = vsel %vm44_vm0, %v40_v0, %v46_v3  ;;  %v59_v16 = vsel %vm45_vm1, 0.25, %v170_v13  ;;  %v64_v18 = vsub.f32 0.0, %v58_v14  ;;  %p141_p10 = scmp.ne.s32.totalorder %s78_s1, %s140_s21  ;;  %p146_p12 = scmp.lt.s32.totalorder %s140_s21, %s140_s21 }
  0x20   :  { %v49_v7 = vsel %vm45_vm1, %v41_v2, %v47_v5  ;;  %v50_v8 = vmax.f32 %v48_v6, 0.0001  ;;  %v65_v20 = vsub.f32 0.0, %v59_v16 }
  0x21   :  { %v51_v9 = vmax.f32 %v49_v7, 0.0001  ;;  %p147_p13 = por %p146_p12, %p145_p11 }
  0x22   :  { %v52_v10 = vmin.f32 %v50_v8, 1.0 }
  0x23   :  { %v53_v11 = vmin.f32 %v51_v9, 1.0  ;;  %p148_p0 = pnand %p147_p13, %p141_p10 }
  0x24   :  { %96 = vlog2.f32 %v52_v10  ;;  %v60_v12 = vsub.f32 1.0, %v52_v10 }
  0x25   :  { %98 = vlog2.f32 %v53_v11  ;;  %v61_v15 = vsub.f32 1.0, %v53_v11 }
  0x26   :  { %v62_v17 = vmul.f32 %v60_v12, %v60_v12 }
  0x27   :  { %v63_v19 = vmul.f32 %v61_v15, %v61_v15 }
  0x28   :  { %v66_v21 = vmul.f32 %v64_v18, %v62_v17 }
  0x29   :  { %v67_v23 = vmul.f32 %v65_v20, %v63_v19 }
  0x31   :  { %v97_v22 = vpop.eup %96 }
  0x32   :  { %v99_v24 = vpop.eup %98  ;;  %v55_v25 = vmul.f32 0.6931472, %v97_v22 }
  0x33   :  { %v57_v26 = vmul.f32 0.6931472, %v99_v24 }
  0x34   :  { %v68_v27 = vmul.f32 %v66_v21, %v55_v25 }
  0x35   :  { %v69_v28 = vmul.f32 %v67_v23, %v57_v26 }
  0x36   :  { %70 = vst [vmem:[#allocation7] sm:$0xff] %v68_v27 }
  0x37   :  { %71 = vst [vmem:[#allocation7 + $0x8] sm:$0xff] %v69_v28 }
  0x38   :  { %151 = shalt.err (!%p148_p0)
}
  0x39   :  { %83 = dma.vmem_to_hbm [thread:$0]  %s78_s1, 256, %s207_s2, [#allocation4], %s167_s12, %s167_s12, %s168_s13  }
  0x3a   :  { %164 = dma.done.wait [#allocation4], 256  }
  0x3b   :  { %165 = vsyncadd [#allocation4], 4294967040 }
  0x3c   :  { %87 = vsyncpa [#allocation3], 1 }
  0x3d   :  { %88 = vsyncpa [#allocation6], 1 }
  0x3e   :  { %89 = vsyncpa [#allocation4], 1 }

</bundles_post_ra>
